<compile_context>
chip_gen: v7x
topology: tpu7x:2x2x1
jax: 0.10.0
libtpu: 0.0.40
codegen_flags: <defaults>
</compile_context>

<pallas_src>
import functools

import numpy as np
import jax
import jax.numpy as jnp
from jax.experimental import pallas as pl
from jax.experimental.pallas import tpu as pltpu


def _gaussian_kernel_1d(ksize, sigma):
    """Replicates cv2.getGaussianKernel(ksize, sigma) for sigma > 0."""
    xs = np.arange(ksize, dtype=np.float64) - (ksize - 1) * 0.5
    k = np.exp(-(xs * xs) / (2.0 * sigma * sigma))
    return k / k.sum()


def _folded_filter_matrix_np(ksize, sigma, n):
    """(n, n) matrix A such that  A @ x == smooth1d_pytorch(x)  for x of shape (n, c).

    Folds together: Conv1d cross-correlation with the Gaussian taps, the
    'same' zero padding (left=(ksize-1)//2), the repeat-last-row padding of x
    up to ksize rows, and the truncation of the output to the first n rows.
    """
    k = _gaussian_kernel_1d(ksize, sigma)
    left = (ksize - 1) // 2
    full = np.zeros((ksize, ksize), dtype=np.float64)
    for t in range(ksize):          # output row (padded-length signal)
        for s in range(ksize):      # input row (padded-length signal)
            j = s - t + left        # tap index into the kernel
            if 0 <= j < ksize:
                full[t, s] = k[j]
    folded = np.zeros((n, n), dtype=np.float64)
    folded[:, : n - 1] = full[:n, : n - 1]
    # rows n-1 .. ksize-1 of the (repeat-padded) input all read x[n-1]
    folded[:, n - 1] = full[:n, n - 1:].sum(axis=1)
    return folded.astype(np.float32)


@functools.lru_cache(maxsize=None)
def _folded_filter_matrix(ksize, sigma, n):
    """Memoized device constant — avoids per-call host work + H2D transfer."""
    return jnp.asarray(_folded_filter_matrix_np(ksize, float(sigma), n))


def smooth1d_kernel(a_ref, x_ref, o_ref):
    """out = A @ x computed as a VPU weighted row-sum (K = n <= 8 rows)."""
    a = a_ref[...]                                   # (n, n), f32, resident
    x = x_ref[...].astype(jnp.float32)               # (n, tc) channel tile
    n = a.shape[0]
    acc = a[:, 0:1] * x[0:1, :]                      # lane-bcast col * sublane-bcast row
    for s in range(1, n):                            # static unrolled, n <= 8
        acc = acc + a[:, s:s + 1] * x[s:s + 1, :]
    o_ref[...] = acc.astype(o_ref.dtype)


def _choose_channel_tile(n, c, itemsize):
    """Pick the channel (lane) tile width.

    Single grid step whenever the slab fits a conservative VMEM budget
    (sized for v7x's 64 MiB physical / 32 MiB default scoped VMEM); otherwise
    the largest 128-multiple tile under the budget that divides c, so lane
    stores stay unmasked and the grid has >= 2 steps (feeds both TCs on v7x).
    """
    budget = 16 << 20                                # bytes of double-buffered tiles
    # per channel column: 2 buffers x (x tile + out tile) x n rows x itemsize
    cap = budget // (4 * n * itemsize)
    cap = max(128, (cap // 128) * 128)
    if c <= cap:
        return c                                     # one grid step, no pipelining
    tc = cap
    while tc >= 128 and c % tc != 0:
        tc -= 128
    if tc < 128:
        # c not divisible by any 128-multiple under the cap: fall back to one
        # full-width block (still correct; only hit for pathological widths).
        return c
    return tc


def smooth1d_forward(x, ksize=8, sigma=7.0):
    """x: (n, c) float with n <= ksize.  Returns (n, c) smoothed rows."""
    n, c = x.shape
    if n > ksize:
        # The PyTorch module's .view(ksize, 1, c) also requires n <= ksize.
        raise ValueError(f"smooth1d_pytorch requires n <= ksize (n={n}, ksize={ksize})")

    a = _folded_filter_matrix(ksize, sigma, n)

    tc = _choose_channel_tile(n, c, jnp.dtype(x.dtype).itemsize)
    grid = (pl.cdiv(c, tc),)

    return pl.pallas_call(
        smooth1d_kernel,
        out_shape=jax.ShapeDtypeStruct((n, c), x.dtype),
        grid=grid,
        in_specs=[
            pl.BlockSpec((n, n), lambda i: (0, 0)),     # filter stays resident
            pl.BlockSpec((n, tc), lambda i: (0, i)),    # stream channel tiles
        ],
        out_specs=pl.BlockSpec((n, tc), lambda i: (0, i)),
        compiler_params=pltpu.CompilerParams(dimension_semantics=("parallel",)),
    )(a, x)


def smooth1d_ref(x, ksize=8, sigma=7.0):
    """Pure-JAX mirror of the PyTorch forward (cross-correlation, 'same' pad)."""
    n, c = x.shape
    k = jnp.asarray(_gaussian_kernel_1d(ksize, sigma), dtype=jnp.float32)
    if n < ksize:
        x = jnp.concatenate(
            [x, jnp.broadcast_to(x[n - 1: n], (ksize - n, c))], axis=0)
    left = (ksize - 1) // 2
    right = (ksize - 1) - left
    xp = jnp.pad(x, ((left, right), (0, 0)))
    rows = [jnp.sum(xp[t: t + ksize] * k[:, None], axis=0) for t in range(ksize)]
    return jnp.stack(rows)[:n]


if __name__ == "__main__":
    KSIZE, SIGMA = 8, 7.0
    key = jax.random.PRNGKey(0)

    # (n, c) test cases:
    #   (6, 256)  n < ksize (repeat-last-row path), c multiple of 128, 1 grid step
    #   (8, 384)  n == ksize, wider channel slab, still 1 grid step
    #   (3, 200)  c not a multiple of 128 -> full-width lane block fallback
    cases = [(6, 256), (8, 384), (3, 200)]
    keys = jax.random.split(key, len(cases))

    for (N, C), k in zip(cases, keys):
        x = jax.random.normal(k, (N, C), dtype=jnp.float32)
        out = jax.block_until_ready(smooth1d_forward(x, ksize=KSIZE, sigma=SIGMA))
        ref = smooth1d_ref(x, ksize=KSIZE, sigma=SIGMA)
        assert out.shape == (N, C), out.shape
        assert jnp.allclose(out, ref, atol=1e-5, rtol=1e-5), (
            (N, C), float(jnp.max(jnp.abs(out - ref))))

    print("KERNEL_OK")
</pallas_src>

<mosaic_0001>
module attributes {stable_mosaic.version = 11 : i64} {
  func.func @smooth1d_kernel(%arg0: i32, %arg1: memref<6x6xf32, #tpu.memory_space<vmem>>, %arg2: memref<6x256xf32, #tpu.memory_space<vmem>>, %arg3: memref<6x256xf32, #tpu.memory_space<vmem>>) attributes {dimension_semantics = [#tpu.dimension_semantics<parallel>], iteration_bounds = array<i64: 1>, scalar_prefetch = 0 : i64, scratch_operands = 0 : i64, tpu.core_type = #tpu.core_type<tc>, window_params = [{pipeline_mode = #tpu.pipeline_mode<synchronous>, transform_indices = @transform_0, window_bounds = array<i64: 6, 6>}, {transform_indices = @transform_1, window_bounds = array<i64: 6, 256>}, {transform_indices = @transform_2, window_bounds = array<i64: 6, 256>}]} {
    %c0 = arith.constant 0 : index
    %c0_0 = arith.constant 0 : index
    %0 = vector.load %arg1[%c0, %c0_0] : memref<6x6xf32, #tpu.memory_space<vmem>>, vector<6x6xf32>
    %c0_1 = arith.constant 0 : index
    %c0_2 = arith.constant 0 : index
    %1 = vector.load %arg2[%c0_1, %c0_2] : memref<6x256xf32, #tpu.memory_space<vmem>>, vector<6x256xf32>
    %2 = vector.extract_strided_slice %0 {offsets = [0, 0], sizes = [6, 1], strides = [1, 1]} : vector<6x6xf32> to vector<6x1xf32>
    %3 = vector.extract_strided_slice %1 {offsets = [0, 0], sizes = [1, 256], strides = [1, 1]} : vector<6x256xf32> to vector<1x256xf32>
    %4 = vector.broadcast %2 : vector<6x1xf32> to vector<6x256xf32>
    %5 = vector.broadcast %3 : vector<1x256xf32> to vector<6x256xf32>
    %6 = arith.mulf %4, %5 : vector<6x256xf32>
    %7 = vector.extract_strided_slice %0 {offsets = [0, 1], sizes = [6, 1], strides = [1, 1]} : vector<6x6xf32> to vector<6x1xf32>
    %8 = vector.extract_strided_slice %1 {offsets = [1, 0], sizes = [1, 256], strides = [1, 1]} : vector<6x256xf32> to vector<1x256xf32>
    %9 = vector.broadcast %7 : vector<6x1xf32> to vector<6x256xf32>
    %10 = vector.broadcast %8 : vector<1x256xf32> to vector<6x256xf32>
    %11 = arith.mulf %9, %10 : vector<6x256xf32>
    %12 = arith.addf %6, %11 : vector<6x256xf32>
    %13 = vector.extract_strided_slice %0 {offsets = [0, 2], sizes = [6, 1], strides = [1, 1]} : vector<6x6xf32> to vector<6x1xf32>
    %14 = vector.extract_strided_slice %1 {offsets = [2, 0], sizes = [1, 256], strides = [1, 1]} : vector<6x256xf32> to vector<1x256xf32>
    %15 = vector.broadcast %13 : vector<6x1xf32> to vector<6x256xf32>
    %16 = vector.broadcast %14 : vector<1x256xf32> to vector<6x256xf32>
    %17 = arith.mulf %15, %16 : vector<6x256xf32>
    %18 = arith.addf %12, %17 : vector<6x256xf32>
    %19 = vector.extract_strided_slice %0 {offsets = [0, 3], sizes = [6, 1], strides = [1, 1]} : vector<6x6xf32> to vector<6x1xf32>
    %20 = vector.extract_strided_slice %1 {offsets = [3, 0], sizes = [1, 256], strides = [1, 1]} : vector<6x256xf32> to vector<1x256xf32>
    %21 = vector.broadcast %19 : vector<6x1xf32> to vector<6x256xf32>
    %22 = vector.broadcast %20 : vector<1x256xf32> to vector<6x256xf32>
    %23 = arith.mulf %21, %22 : vector<6x256xf32>
    %24 = arith.addf %18, %23 : vector<6x256xf32>
    %25 = vector.extract_strided_slice %0 {offsets = [0, 4], sizes = [6, 1], strides = [1, 1]} : vector<6x6xf32> to vector<6x1xf32>
    %26 = vector.extract_strided_slice %1 {offsets = [4, 0], sizes = [1, 256], strides = [1, 1]} : vector<6x256xf32> to vector<1x256xf32>
    %27 = vector.broadcast %25 : vector<6x1xf32> to vector<6x256xf32>
    %28 = vector.broadcast %26 : vector<1x256xf32> to vector<6x256xf32>
    %29 = arith.mulf %27, %28 : vector<6x256xf32>
    %30 = arith.addf %24, %29 : vector<6x256xf32>
    %31 = vector.extract_strided_slice %0 {offsets = [0, 5], sizes = [6, 1], strides = [1, 1]} : vector<6x6xf32> to vector<6x1xf32>
    %32 = vector.extract_strided_slice %1 {offsets = [5, 0], sizes = [1, 256], strides = [1, 1]} : vector<6x256xf32> to vector<1x256xf32>
    %33 = vector.broadcast %31 : vector<6x1xf32> to vector<6x256xf32>
    %34 = vector.broadcast %32 : vector<1x256xf32> to vector<6x256xf32>
    %35 = arith.mulf %33, %34 : vector<6x256xf32>
    %36 = arith.addf %30, %35 : vector<6x256xf32>
    %c0_3 = arith.constant 0 : index
    %c0_4 = arith.constant 0 : index
    %37 = vector.load %arg3[%c0_3, %c0_4] : memref<6x256xf32, #tpu.memory_space<vmem>>, vector<6x256xf32>
    tpu.vector_store %arg3[%c0_3, %c0_4], %36 {strides = array<i32>} : memref<6x256xf32, #tpu.memory_space<vmem>>, vector<6x256xf32>,
    return
  }
  func.func @transform_0(%arg0: i32) -> (i32, i32) {
    %c0_i32 = arith.constant 0 : i32
    %c0_i32_0 = arith.constant 0 : i32
    %c0_i32_1 = arith.constant 0 : i32
    return %c0_i32, %c0_i32_0 : i32, i32
  }
  func.func @transform_1(%arg0: i32) -> (i32, i32) {
    %c0_i32 = arith.constant 0 : i32
    %c0_i32_0 = arith.constant 0 : i32
    return %c0_i32, %arg0 : i32, i32
  }
  func.func @transform_2(%arg0: i32) -> (i32, i32) {
    %c0_i32 = arith.constant 0 : i32
    %c0_i32_0 = arith.constant 0 : i32
    return %c0_i32, %arg0 : i32, i32
  }
}

</mosaic_0001>

<bundles_post_ra>
// kernel: tpu_custom_call.1
= control target key start
LH: loop header
LB: loop body
LE: loop exit
PB: predicated region body
PF: predicated region fallthrough
CT: control target
= control target key end

     0   :  { %7 = vsyncpa [#allocation3], 0  ;;  %s299_s0 = inlined_call_operand.hbm [shape: f32[6,6], index: 0, kind: input, shape index: {}]   ;;  %s300_s1 = inlined_call_operand.hbm [shape: f32[6,256], index: 1, kind: input, shape index: {}]   ;;  %s301_s2 = inlined_call_operand.hbm [shape: f32[6,256], index: 2, kind: output, shape index: {}]  }
   0x1   :  { %8 = vsyncpa [#allocation6], 0 }
   0x2   :  { %9 = vsyncpa [#allocation4], 0  ;;  %s239_s9 = smov [#allocation2]   ;;  %s240_s11 = smov [#allocation5]  }
   0x3   :  { %s16_s10 = sshll.u32 %s239_s9, 4  ;;  %s26_s12 = sshll.u32 %s240_s11, 4  ;;  %s17_s10 = int_to_ptr.vmem [resolvable:$true] %s16_s10  ;;  %s27_s12 = int_to_ptr.vmem [resolvable:$true] %s26_s12 }
   0x4   :  { %s167_s15 = scalar_lea.hbm %s299_s0, 128 }
   0x5   :  { %p168_p0 = scmp.ne.s32.totalorder %s299_s0, %s167_s15  ;;  %p171_p1 = scmp.lt.u32.totalorder %s167_s15, %s299_s0 }
   0x7   :  { %p173_p2 = pnand %p171_p1, %p168_p0 }
   0x9   :  { %176 = shalt.err (!%p173_p2)
}
   0xa   :  { %s177_s20 = scalar_lea.vmem %s17_s10, 128  ;;  %p182_p4 = scmp.lt.s32.totalorder %s17_s10, %s17_s10 }
   0xb   :  { %p178_p3 = scmp.ne.s32.totalorder %s17_s10, %s177_s20  ;;  %p183_p5 = scmp.lt.s32.totalorder %s177_s20, %s177_s20 }
   0xd   :  { %p184_p6 = por %p183_p5, %p182_p4 }
   0xf   :  { %p185_p7 = pnand %p184_p6, %p178_p3 }
  0x11   :  { %188 = shalt.err (!%p185_p7)
}
  0x12   :  { %19 = dma.hbm_to_vmem [thread:$0]  %s299_s0, 128, %s17_s10, [#allocation3]  }
  0x13   :  { %s189_s25 = scalar_lea.hbm %s300_s1, 256 }
  0x14   :  { %p190_p8 = scmp.ne.s32.totalorder %s300_s1, %s189_s25  ;;  %p193_p9 = scmp.lt.u32.totalorder %s189_s25, %s300_s1 }
  0x16   :  { %p195_p10 = pnand %p193_p9, %p190_p8 }
  0x18   :  { %198 = shalt.err (!%p195_p10)
}
  0x19   :  { %s199_s30 = scalar_lea.vmem %s27_s12, 256  ;;  %p204_p12 = scmp.lt.s32.totalorder %s27_s12, %s27_s12 }
  0x1a   :  { %p200_p11 = scmp.ne.s32.totalorder %s27_s12, %s199_s30  ;;  %p205_p13 = scmp.lt.s32.totalorder %s199_s30, %s199_s30 }
  0x1c   :  { %p206_p0 = por %p205_p13, %p204_p12 }
  0x1e   :  { %p207_p1 = pnand %p206_p0, %p200_p11 }
  0x20   :  { %210 = shalt.err (!%p207_p1)
}
  0x21   :  { %29 = dma.hbm_to_vmem [thread:$0]  %s300_s1, 256, %s27_s12, [#allocation6]  }
  0x22   :  { %233 = dma.done.wait [#allocation3], 128  }
  0x23   :  { %234 = vsyncadd [#allocation3], 4294967168 }
  0x24   :  { %235 = dma.done.wait [#allocation6], 256  }
  0x25   :  { %236 = vsyncadd [#allocation6], 4294967040  ;;  %v241_v0 = vmov 0   ;;  %v242_v1 = vmov 2   ;;  %v36_v2 = vld [vmem:[#allocation2] sm:$0x3f]  ;;  %v44_v7 = vlaneseq }
  0x26   :  { %161 = vset.pattern.permute.xlu0 %v241_v0  ;;  %163 = vset.pattern.permute.xlu1 %v242_v1  ;;  %v243_v3 = vmov 1   ;;  %v244_v4 = vmov 3   ;;  %v245_v5 = vmov 4   ;;  %v246_v6 = vmov 5   ;;  %v37_v11 = vld [vmem:[#allocation5] sm:$0x3f] }
  0x27   :  { %41 = vperm.xlu0 %161, %v36_v2   ;;  %71 = vperm.xlu1 %163, %v36_v2   ;;  %v45_v8 = vshrl.u32 %v44_v7, 7  ;;  %v38_v12 = vld [vmem:[#allocation5 + $0x8] sm:$0x3f]  ;;  %s247_s1 = smov [#allocation7]  }
  0x28   :  { %s142_s4 = sshll.u32 %s247_s1, 4  ;;  %s143_s4 = int_to_ptr.vmem [resolvable:$true] %s142_s4 }
  0x29   :  { %v46_v9 = vsub.s32 0, %v45_v8  ;;  %v60_v10 = vsub.s32 1, %v45_v8  ;;  %v76_v14 = vsub.s32 2, %v45_v8  ;;  %v92_v16 = vsub.s32 3, %v45_v8  ;;  %s211_s5 = scalar_lea.vmem %s143_s4, 256  ;;  %p216_p3 = scmp.lt.s32.totalorder %s143_s4, %s143_s4 }
  0x2a   :  { %v108_v21 = vsub.s32 4, %v45_v8  ;;  %v124_v22 = vsub.s32 5, %v45_v8  ;;  %p212_p2 = scmp.ne.s32.totalorder %s143_s4, %s211_s5  ;;  %p217_p4 = scmp.lt.s32.totalorder %s211_s5, %s211_s5 }
  0x2b   :  { %162 = vset.pattern.permute.xlu0 %v243_v3  ;;  %164 = vset.pattern.permute.xlu1 %v244_v4  ;;  %v47_v17 = vrot.slane %v37_v11, %v46_v9  ;;  %v51_v18 = vrot.slane %v38_v12, %v46_v9  ;;  %v61_v19 = vrot.slane %v37_v11, %v60_v10 }
  0x2c   :  { %55 = vperm.xlu0 %162, %v36_v2   ;;  %87 = vperm.xlu1 %164, %v36_v2   ;;  %v65_v20 = vrot.slane %v38_v12, %v60_v10  ;;  %v77_v23 = vrot.slane %v37_v11, %v76_v14  ;;  %v81_v24 = vrot.slane %v38_v12, %v76_v14  ;;  %p218_p5 = por %p217_p4, %p216_p3 }
  0x2d   :  { %v93_v26 = vrot.slane %v37_v11, %v92_v16  ;;  %v97_v27 = vrot.slane %v38_v12, %v92_v16  ;;  %v109_v33 = vrot.slane %v37_v11, %v108_v21  ;;  %v113_v34 = vrot.slane %v38_v12, %v108_v21 }
  0x2e   :  { %v125_v35 = vrot.slane %v37_v11, %v124_v22  ;;  %v129_v36 = vrot.slane %v38_v12, %v124_v22  ;;  %p219_p6 = pnand %p218_p5, %p212_p2 }
  0x30   :  { %165 = vset.pattern.permute.xlu1 %v245_v5  ;;  %166 = vset.pattern.permute.xlu0 %v246_v6 }
  0x31   :  { %103 = vperm.xlu1 %165, %v36_v2   ;;  %119 = vperm.xlu0 %166, %v36_v2  }
  0xa6   :  { %v42_v13 = vpop.permute.xlu0 %41  ;;  %v72_v15 = vpop.permute.xlu1 %71 }
  0xa7   :  { %v52_v29 = vmul.f32 %v47_v17, %v42_v13  ;;  %v53_v30 = vmul.f32 %v51_v18, %v42_v13  ;;  %v82_v37 = vmul.f32 %v77_v23, %v72_v15  ;;  %v83_v38 = vmul.f32 %v81_v24, %v72_v15 }
  0xab   :  { %v56_v25 = vpop.permute.xlu0 %55  ;;  %v88_v28 = vpop.permute.xlu1 %87 }
  0xac   :  { %v66_v31 = vmul.f32 %v61_v19, %v56_v25  ;;  %v67_v32 = vmul.f32 %v65_v20, %v56_v25  ;;  %v98_v43 = vmul.f32 %v93_v26, %v88_v28  ;;  %v99_v44 = vmul.f32 %v97_v27, %v88_v28 }
  0xae   :  { %v68_v39 = vadd.f32 %v66_v31, %v52_v29  ;;  %v69_v40 = vadd.f32 %v67_v32, %v53_v30 }
  0xb0   :  { %v84_v41 = vadd.f32 %v82_v37, %v68_v39  ;;  %v85_v42 = vadd.f32 %v83_v38, %v69_v40  ;;  %v104_v45 = vpop.permute.xlu1 %103  ;;  %v120_v46 = vpop.permute.xlu0 %119 }
  0xb1   :  { %v114_v47 = vmul.f32 %v109_v33, %v104_v45  ;;  %v115_v48 = vmul.f32 %v113_v34, %v104_v45  ;;  %v130_v51 = vmul.f32 %v125_v35, %v120_v46  ;;  %v131_v52 = vmul.f32 %v129_v36, %v120_v46 }
  0xb2   :  { %v100_v49 = vadd.f32 %v98_v43, %v84_v41  ;;  %v101_v50 = vadd.f32 %v99_v44, %v85_v42 }
  0xb4   :  { %v116_v53 = vadd.f32 %v114_v47, %v100_v49  ;;  %v117_v54 = vadd.f32 %v115_v48, %v101_v50 }
  0xb6   :  { %v132_v55 = vadd.f32 %v130_v51, %v116_v53  ;;  %v133_v56 = vadd.f32 %v131_v52, %v117_v54 }
  0xb8   :  { %134 = vst [vmem:[#allocation7] sm:$0x3f] %v132_v55  ;;  %135 = vst [vmem:[#allocation7 + $0x8] sm:$0x3f] %v133_v56 }
  0xb9   :  { %222 = shalt.err (!%p219_p6)
}
  0xba   :  { %s223_s8 = scalar_lea.hbm %s301_s2, 256 }
  0xbb   :  { %p224_p7 = scmp.ne.s32.totalorder %s301_s2, %s223_s8  ;;  %p227_p8 = scmp.lt.u32.totalorder %s223_s8, %s301_s2 }
  0xbd   :  { %p229_p9 = pnand %p227_p8, %p224_p7 }
  0xbf   :  { %232 = shalt.err (!%p229_p9)
}
  0xc0   :  { %145 = dma.vmem_to_hbm [thread:$0]  %s143_s4, 256, %s301_s2, [#allocation4]  }
  0xc1   :  { %237 = dma.done.wait [#allocation4], 256  }
  0xc2   :  { %238 = vsyncadd [#allocation4], 4294967040 }
  0xc3   :  { %149 = vsyncpa [#allocation3], 1 }
  0xc4   :  { %150 = vsyncpa [#allocation6], 1 }
  0xc5   :  { %151 = vsyncpa [#allocation4], 1 }

</bundles_post_ra>
